<compile_context>
chip_gen: v5e
topology: v5e:2x2
jax: 0.10.0
libtpu: 0.0.40
codegen_flags: <defaults>
</compile_context>

<pallas_src>
from typing import NamedTuple, Optional

import jax
import jax.numpy as jnp
from jax.experimental import pallas as pl
from jax.experimental.pallas import tpu as pltpu


def _round_up(x: int, m: int) -> int:
    return ((x + m - 1) // m) * m


def _vmem_capacity_bytes() -> int:
    """Physical per-core VMEM; falls back to the most conservative (v7x) value."""
    try:
        info = pltpu.get_tpu_info()
        cap = getattr(info, "vmem_capacity_bytes", None)
        if cap:
            return int(cap)
    except Exception:
        pass
    return 64 << 20  # v7x per-TensorCore VMEM


# --------------------------------------------------------------------------- #
# Kernels
# --------------------------------------------------------------------------- #
def _unembed_kernel_acc(x_ref, w_ref, o_ref, acc_ref):
    """K-tiled matmul with an f32 VMEM accumulator resident across the K axis."""

    @pl.when(pl.program_id(2) == 0)
    def _():
        acc_ref[...] = jnp.zeros_like(acc_ref)

    acc_ref[...] += jnp.dot(
        x_ref[...], w_ref[...], preferred_element_type=jnp.float32
    )

    @pl.when(pl.program_id(2) == pl.num_programs(2) - 1)
    def _():
        o_ref[...] = acc_ref[...].astype(o_ref.dtype)


def _unembed_kernel_single_k(x_ref, w_ref, o_ref):
    """Single-K-tile matmul: no accumulator scratch, no init/finalize branches."""
    o_ref[...] = jnp.dot(
        x_ref[...], w_ref[...], preferred_element_type=jnp.float32
    ).astype(o_ref.dtype)


# --------------------------------------------------------------------------- #
# Weight preparation (done once at init; hoists the vocab-matrix pad/cast out
# of the per-call path)
# --------------------------------------------------------------------------- #
class UnembedParams(NamedTuple):
    w_padded: jax.Array  # (k_pad, n_pad), already in compute dtype
    d_model: int
    d_vocab: int
    tn: int
    tk: int


def prepare_unembed(
    w_u: jax.Array,
    *,
    compute_dtype: Optional[jnp.dtype] = jnp.bfloat16,
    tn: int = 1024,
    tk: int = 2048,
) -> UnembedParams:
    """Pad and (optionally) cast W_U once.

    compute_dtype=jnp.bfloat16 (default) halves the dominant weight HBM stream
    and runs the MXU at full rate; pass None for exact f32 logits.
    """
    d_model, d_vocab = w_u.shape

    tk_eff = min(tk, _round_up(d_model, 128))
    tn_eff = min(tn, _round_up(d_vocab, 128))
    k_pad = _round_up(d_model, tk_eff)
    n_pad = _round_up(d_vocab, tn_eff)

    w = w_u
    if compute_dtype is not None:
        w = w.astype(compute_dtype)
    if (k_pad, n_pad) != (d_model, d_vocab):
        w = jnp.pad(w, ((0, k_pad - d_model), (0, n_pad - d_vocab)))

    return UnembedParams(w, d_model, d_vocab, tn_eff, tk_eff)


# --------------------------------------------------------------------------- #
# Forward
# --------------------------------------------------------------------------- #
def unembed(
    normalized_resid_final: jax.Array,
    params: UnembedParams,
    *,
    tm: int = 512,
    out_dtype: Optional[jnp.dtype] = None,
) -> jax.Array:
    """normalized_resid_final: (batch, posn, d_model) -> (batch, posn, d_vocab)."""
    b, p, d_model = normalized_resid_final.shape
    assert d_model == params.d_model, "d_model mismatch vs prepared weight"

    w = params.w_padded
    k_pad, n_pad = w.shape
    d_vocab = params.d_vocab
    tn_eff, tk_eff = params.tn, params.tk

    out_dtype = out_dtype if out_dtype is not None else normalized_resid_final.dtype
    in_bytes = jnp.dtype(w.dtype).itemsize
    out_bytes = jnp.dtype(out_dtype).itemsize

    m = b * p
    x2d = normalized_resid_final.reshape(m, d_model)
    if x2d.dtype != w.dtype:
        x2d = x2d.astype(w.dtype)  # match compute dtype (bf16 by default)

    # --- M tile: for decode-sized M collapse to one block so W_U streams once.
    m_align = _round_up(m, 16)  # 16 covers f32 (8) and bf16 (16) sublanes
    if m <= 512:
        tm_eff = m_align
    else:
        tm_eff = min(tm, m_align)

    # --- Generation-aware VMEM budgeting: shrink tiles if they don't fit.
    cap = _vmem_capacity_bytes()
    budget = int(cap * 0.7)

    def footprint(tm_, tn_, tk_):
        with_acc = (k_pad // tk_) > 1
        f = 2 * tm_ * tk_ * in_bytes      # x, double buffered
        f += 2 * tk_ * tn_ * in_bytes     # w, double buffered
        f += 2 * tm_ * tn_ * out_bytes    # out, double buffered
        if with_acc:
            f += tm_ * tn_ * 4            # f32 accumulator scratch
        return f

    while footprint(tm_eff, tn_eff, tk_eff) > budget:
        if tk_eff >= 256 and tk_eff % 256 == 0:
            tk_eff //= 2
        elif tn_eff >= 256 and tn_eff % 256 == 0:
            tn_eff //= 2
        elif tm_eff >= 32 and tm_eff % 32 == 0:
            tm_eff //= 2
        else:
            break

    fp = footprint(tm_eff, tn_eff, tk_eff)
    vmem_limit = max(fp + (8 << 20), 32 << 20)
    vmem_limit = min(vmem_limit, int(cap * 0.9))

    # --- Pad activations only (weight is already padded at prepare time).
    m_pad = _round_up(m, tm_eff)
    if (m_pad, k_pad) != (m, d_model):
        x2d = jnp.pad(x2d, ((0, m_pad - m), (0, k_pad - d_model)))

    gm = m_pad // tm_eff
    gn = n_pad // tn_eff
    gk = k_pad // tk_eff

    x_bytes = jnp.dtype(x2d.dtype).itemsize
    cost = pl.CostEstimate(
        flops=2 * m * d_vocab * d_model,
        transcendentals=0,
        bytes_accessed=(
            m * d_model * x_bytes
            + d_model * d_vocab * in_bytes
            + m * d_vocab * out_bytes
        ),
    )

    if gk == 1:
        # Single K tile: no accumulator scratch, 2-D grid.
        out2d = pl.pallas_call(
            _unembed_kernel_single_k,
            out_shape=jax.ShapeDtypeStruct((m_pad, n_pad), out_dtype),
            grid=(gm, gn),
            in_specs=[
                pl.BlockSpec((tm_eff, tk_eff), lambda i, j: (i, 0)),
                pl.BlockSpec((tk_eff, tn_eff), lambda i, j: (0, j)),
            ],
            out_specs=pl.BlockSpec((tm_eff, tn_eff), lambda i, j: (i, j)),
            compiler_params=pltpu.CompilerParams(
                dimension_semantics=("parallel", "parallel"),
                vmem_limit_bytes=vmem_limit,
            ),
            cost_estimate=cost,
        )(x2d, w)
    else:
        out2d = pl.pallas_call(
            _unembed_kernel_acc,
            out_shape=jax.ShapeDtypeStruct((m_pad, n_pad), out_dtype),
            grid=(gm, gn, gk),
            in_specs=[
                pl.BlockSpec((tm_eff, tk_eff), lambda i, j, k: (i, k)),
                pl.BlockSpec((tk_eff, tn_eff), lambda i, j, k: (k, j)),
            ],
            out_specs=pl.BlockSpec((tm_eff, tn_eff), lambda i, j, k: (i, j)),
            scratch_shapes=[pltpu.VMEM((tm_eff, tn_eff), jnp.float32)],
            compiler_params=pltpu.CompilerParams(
                dimension_semantics=("parallel", "parallel", "arbitrary"),
                vmem_limit_bytes=vmem_limit,
            ),
            cost_estimate=cost,
        )(x2d, w)

    return out2d[:m, :d_vocab].reshape(b, p, d_vocab)


def unembed_from_weight(
    normalized_resid_final: jax.Array,
    w_u: jax.Array,
    *,
    compute_dtype: Optional[jnp.dtype] = jnp.bfloat16,
    tm: int = 512,
    tn: int = 1024,
    tk: int = 2048,
    out_dtype: Optional[jnp.dtype] = None,
) -> jax.Array:
    """Convenience wrapper: prepares the weight and runs the kernel in one call."""
    params = prepare_unembed(w_u, compute_dtype=compute_dtype, tn=tn, tk=tk)
    return unembed(normalized_resid_final, params, tm=tm, out_dtype=out_dtype)


if __name__ == "__main__":
    # Small config consistent with the module (W_U = eye(d_model) => d_vocab == d_model).
    batch, posn, d_model = 2, 8, 32

    key = jax.random.PRNGKey(0)
    x = jax.random.normal(key, (batch, posn, d_model), dtype=jnp.float32)

    # Deterministic parameter init, exactly as in the module's __init__.
    W_U = jnp.eye(d_model, dtype=jnp.float32)
    ref = jnp.einsum("bpd,dv->bpv", x, W_U)

    # Exact f32 path (compute_dtype=None): must match the einsum reference.
    params_f32 = prepare_unembed(W_U, compute_dtype=None)
    out_f32 = jax.block_until_ready(unembed(x, params_f32))
    assert out_f32.shape == (batch, posn, d_model)
    assert jnp.allclose(out_f32, ref, atol=1e-5), "f32 mismatch vs reference"

    # Default bf16-operand path (f32 accumulation), weight prepared once at init.
    params_bf16 = prepare_unembed(W_U)
    out_bf16 = jax.block_until_ready(unembed(x, params_bf16))
    assert out_bf16.shape == (batch, posn, d_model)
    assert jnp.allclose(out_bf16, ref, atol=2e-2, rtol=2e-2), "bf16 mismatch vs reference"

    # Exercise the multi-K accumulator path with forced small tiles and a
    # non-square weight (general trained-W_U case), exact f32.
    d_model2, d_vocab2 = 256, 160
    x2 = jax.random.normal(jax.random.PRNGKey(1), (batch, posn, d_model2), dtype=jnp.float32)
    w2 = jax.random.normal(jax.random.PRNGKey(2), (d_model2, d_vocab2), dtype=jnp.float32)
    ref2 = jnp.einsum("bpd,dv->bpv", x2, w2)
    params2 = prepare_unembed(w2, compute_dtype=None, tn=128, tk=128)
    out2 = jax.block_until_ready(unembed(x2, params2))
    assert out2.shape == (batch, posn, d_vocab2)
    assert jnp.allclose(out2, ref2, atol=1e-4, rtol=1e-4), "multi-K mismatch vs reference"

    print("KERNEL_OK")
</pallas_src>

<mosaic_0001>
module attributes {stable_mosaic.version = 11 : i64} {
  func.func @_unembed_kernel_single_k(%arg0: i32, %arg1: i32, %arg2: memref<16x128xf32, #tpu.memory_space<vmem>>, %arg3: memref<128x128xf32, #tpu.memory_space<vmem>>, %arg4: memref<16x128xf32, #tpu.memory_space<vmem>>) attributes {dimension_semantics = [#tpu.dimension_semantics<parallel>, #tpu.dimension_semantics<parallel>], iteration_bounds = array<i64: 1, 1>, scalar_prefetch = 0 : i64, scratch_operands = 0 : i64, tpu.core_type = #tpu.core_type<tc>, window_params = [{transform_indices = @transform_0, window_bounds = array<i64: 16, 128>}, {transform_indices = @transform_1, window_bounds = array<i64: 128, 128>}, {transform_indices = @transform_2, window_bounds = array<i64: 16, 128>}]} {
    %c0 = arith.constant 0 : index
    %c0_0 = arith.constant 0 : index
    %0 = vector.load %arg2[%c0, %c0_0] : memref<16x128xf32, #tpu.memory_space<vmem>>, vector<16x128xf32>
    %c0_1 = arith.constant 0 : index
    %c0_2 = arith.constant 0 : index
    %1 = vector.load %arg3[%c0_1, %c0_2] : memref<128x128xf32, #tpu.memory_space<vmem>>, vector<128x128xf32>
    %cst = arith.constant dense<0.000000e+00> : vector<16x128xf32>
    %2 = tpu.matmul %0, %1, %cst {dimension_numbers = #tpu.dot_dimension_numbers<[1], [0], [0], [1], [0, 0, 1, 1], [], []>} : vector<16x128xf32>, vector<128x128xf32>, vector<16x128xf32> -> vector<16x128xf32>
    %c0_3 = arith.constant 0 : index
    %c0_4 = arith.constant 0 : index
    %3 = vector.load %arg4[%c0_3, %c0_4] : memref<16x128xf32, #tpu.memory_space<vmem>>, vector<16x128xf32>
    tpu.vector_store %arg4[%c0_3, %c0_4], %2 {strides = array<i32>} : memref<16x128xf32, #tpu.memory_space<vmem>>, vector<16x128xf32>,
    return
  }
  func.func @transform_0(%arg0: i32, %arg1: i32) -> (i32, i32) {
    %c0_i32 = arith.constant 0 : i32
    %c0_i32_0 = arith.constant 0 : i32
    return %arg0, %c0_i32 : i32, i32
  }
  func.func @transform_1(%arg0: i32, %arg1: i32) -> (i32, i32) {
    %c0_i32 = arith.constant 0 : i32
    %c0_i32_0 = arith.constant 0 : i32
    return %c0_i32, %arg1 : i32, i32
  }
  func.func @transform_2(%arg0: i32, %arg1: i32) -> (i32, i32) {
    %c0_i32 = arith.constant 0 : i32
    return %arg0, %arg1 : i32, i32
  }
}

</mosaic_0001>

<bundles_post_ra>
// kernel: tpu_custom_call.1
= control target key start
LH: loop header
LB: loop body
LE: loop exit
PB: predicated region body
PF: predicated region fallthrough
CT: control target
= control target key end

     0   :  { %7 = vsyncpa [#allocation3], 0  ;;  %s244_s0 = inlined_call_operand.hbm [shape: f32[16,128], index: 0, kind: input, shape index: {}]   ;;  %s245_s1 = inlined_call_operand.hbm [shape: f32[128,128], index: 1, kind: input, shape index: {}]   ;;  %s246_s2 = inlined_call_operand.hbm [shape: f32[16,128], index: 2, kind: output, shape index: {}]  }
   0x1   :  { %8 = vsyncpa [#allocation6], 0 }
   0x2   :  { %9 = vsyncpa [#allocation4], 0  ;;  %s14_s11 = sshll.u32 %s244_s0, 4  ;;  %s206_s12 = smov [#allocation2]   ;;  %s15_s11 = int_to_ptr.hbm [resolvable:$true] %s14_s11 }
   0x3   :  { %s16_s13 = sshll.u32 %s206_s12, 4  ;;  %s27_s16 = sshll.u32 %s245_s1, 4  ;;  %s17_s13 = int_to_ptr.vmem [resolvable:$true] %s16_s13  ;;  %s28_s16 = int_to_ptr.hbm [resolvable:$true] %s27_s16 }
   0x4   :  { %s207_s17 = smov 128   ;;  %s208_s18 = smov 8  }
   0x5   :  { %22 = dma.hbm_to_vmem [thread:$0]  %s15_s11, 256, %s17_s13, [#allocation3], %s207_s17, %s207_s17, %s208_s18  }
   0x6   :  { %s209_s19 = smov [#allocation5]  }
   0x7   :  { %s29_s20 = sshll.u32 %s209_s19, 4  ;;  %s30_s20 = int_to_ptr.vmem [resolvable:$true] %s29_s20 }
   0x8   :  { %35 = dma.hbm_to_vmem [thread:$0]  %s28_s16, 2048, %s30_s20, [#allocation6], %s207_s17, %s207_s17, %s208_s18  }
   0x9   :  { %200 = dma.done.wait [#allocation3], 256  }
   0xa   :  { %201 = vsyncadd [#allocation3], 4294967040 }
   0xb   :  { %202 = dma.done.wait [#allocation6], 2048  }
   0xc   :  { %203 = vsyncadd [#allocation6], 4294965248  ;;  %v61_v0 = vld [vmem:[#allocation5 + $0x78] sm:$0xff]  ;;  %v60_v1 = vld [vmem:[#allocation5 + $0x70] sm:$0xff]  ;;  %s210_s0 = smov [#allocation7]   ;;  %s93_s23 = sshll.u32 %s246_s2, 4  ;;  %s94_s23 = int_to_ptr.hbm [resolvable:$true] %s93_s23 }
   0xd   :  { %62 = vmatpush.msra.mxu0 %v61_v0  ;;  %107 = vmatpush.msra.mxu1 %v61_v0  ;;  %v59_v2 = vld [vmem:[#allocation5 + $0x68] sm:$0xff]  ;;  %v58_v3 = vld [vmem:[#allocation5 + $0x60] sm:$0xff]  ;;  %v57_v4 = vld [vmem:[#allocation5 + $0x58] sm:$0xff]  ;;  %s91_s1 = sshll.u32 %s210_s0, 4  ;;  %s92_s1 = int_to_ptr.vmem [resolvable:$true] %s91_s1 }
   0xe   :  { %v56_v5 = vld [vmem:[#allocation5 + $0x50] sm:$0xff]  ;;  %v55_v6 = vld [vmem:[#allocation5 + $0x48] sm:$0xff]  ;;  %v54_v7 = vld [vmem:[#allocation5 + $0x40] sm:$0xff] }
   0xf   :  { %63 = vmatpush.msra.mxu0 %v60_v1  ;;  %108 = vmatpush.msra.mxu1 %v60_v1  ;;  %v53_v8 = vld [vmem:[#allocation5 + $0x38] sm:$0xff]  ;;  %v52_v9 = vld [vmem:[#allocation5 + $0x30] sm:$0xff]  ;;  %v51_v10 = vld [vmem:[#allocation5 + $0x28] sm:$0xff] }
  0x10   :  { %v50_v11 = vld [vmem:[#allocation5 + $0x20] sm:$0xff]  ;;  %v49_v12 = vld [vmem:[#allocation5 + $0x18] sm:$0xff]  ;;  %v48_v13 = vld [vmem:[#allocation5 + $0x10] sm:$0xff] }
  0x11   :  { %64 = vmatpush.msra.mxu0 %v59_v2  ;;  %109 = vmatpush.msra.mxu1 %v59_v2  ;;  %v47_v14 = vld [vmem:[#allocation5 + $0x8] sm:$0xff]  ;;  %v46_v15 = vld [vmem:[#allocation5] sm:$0xff]  ;;  %v44_v16 = vld [vmem:[#allocation2] sm:$0xff] }
  0x12   :  { %v45_v17 = vld [vmem:[#allocation2 + $0x8] sm:$0xff] }
  0x13   :  { %65 = vmatpush.msra.mxu0 %v58_v3  ;;  %110 = vmatpush.msra.mxu1 %v58_v3 }
  0x15   :  { %66 = vmatpush.msra.mxu0 %v57_v4  ;;  %111 = vmatpush.msra.mxu1 %v57_v4 }
  0x17   :  { %67 = vmatpush.msra.mxu0 %v56_v5  ;;  %112 = vmatpush.msra.mxu1 %v56_v5 }
  0x19   :  { %68 = vmatpush.msra.mxu0 %v55_v6  ;;  %113 = vmatpush.msra.mxu1 %v55_v6 }
  0x1b   :  { %69 = vmatpush.msra.mxu0 %v54_v7  ;;  %114 = vmatpush.msra.mxu1 %v54_v7 }
  0x1d   :  { %70 = vmatpush.msra.mxu0 %v53_v8  ;;  %115 = vmatpush.msra.mxu1 %v53_v8 }
  0x1f   :  { %71 = vmatpush.msra.mxu0 %v52_v9  ;;  %116 = vmatpush.msra.mxu1 %v52_v9 }
  0x21   :  { %72 = vmatpush.msra.mxu0 %v51_v10  ;;  %117 = vmatpush.msra.mxu1 %v51_v10 }
  0x23   :  { %73 = vmatpush.msra.mxu0 %v50_v11  ;;  %118 = vmatpush.msra.mxu1 %v50_v11 }
  0x25   :  { %74 = vmatpush.msra.mxu0 %v49_v12  ;;  %119 = vmatpush.msra.mxu1 %v49_v12 }
  0x27   :  { %75 = vmatpush.msra.mxu0 %v48_v13  ;;  %120 = vmatpush.msra.mxu1 %v48_v13 }
  0x29   :  { %76 = vmatpush.msra.mxu0 %v47_v14  ;;  %121 = vmatpush.msra.mxu1 %v47_v14 }
  0x2b   :  { %77 = vmatpush.msra.mxu0 %v46_v15  ;;  %122 = vmatpush.msra.mxu1 %v46_v15 }
  0x2c   :  { %78 = vmatmul.f32.vlgmr.msra.gmra.mxu0 %v44_v16  ;;  %81 = vmatmul.f32.vlgmr.msra.gmra.mxu1 %v45_v17 }
  0xa9   :  { %v79_v18 = vpop.f32.mrf.mxu0  ;;  %v82_v19 = vpop.f32.mrf.mxu1 }
  0xaa   :  { %85 = vst [vmem:[#allocation7] sm:$0xff] %v79_v18 }
  0xab   :  { %86 = vst [vmem:[#allocation7 + $0x8] sm:$0xff] %v82_v19 }
  0xac   :  { %99 = dma.vmem_to_hbm [thread:$0]  %s92_s1, 256, %s94_s23, [#allocation4], %s207_s17, %s207_s17, %s208_s18  }
  0xad   :  { %204 = dma.done.wait [#allocation4], 256  }
  0xae   :  { %205 = vsyncadd [#allocation4], 4294967040 }
  0xaf   :  { %104 = vsyncpa [#allocation3], 1 }
  0xb0   :  { %105 = vsyncpa [#allocation6], 1 }
  0xb1   :  { %106 = vsyncpa [#allocation4], 1 }

</bundles_post_ra>
